<compile_context>
chip_gen: v5e
topology: v5e:2x2
jax: 0.10.0
libtpu: 0.0.40
codegen_flags: <defaults>
</compile_context>

<pallas_src>
import jax
import jax.numpy as jnp
from jax.experimental import pallas as pl
from jax.experimental.pallas import tpu as pltpu

HIDDEN = 64
LANE = 128


def _round_up(v, m):
    return ((v + m - 1) // m) * m


def dqn_kernel(x_ref, w1_ref, b1_ref, w2_ref, b2_ref, o_ref):
    a_dim = o_ref.shape[-1]
    # cast x to bf16 in-kernel (saves a separate XLA pass over x in HBM)
    x = x_ref[...].astype(jnp.bfloat16)
    # layer1: (TB, s_dim)bf16 @ (s_dim, 128)bf16 -> f32 acc; bias + ReLU in f32
    h = jnp.dot(x, w1_ref[...], preferred_element_type=jnp.float32)
    h = jnp.maximum(h + b1_ref[...], 0.0)
    # layer2: (TB, 128)bf16 @ (128, 128)bf16 -> f32 acc; bias + ReLU in f32
    y = jnp.dot(h.astype(jnp.bfloat16), w2_ref[...],
                preferred_element_type=jnp.float32)
    y = jnp.maximum(y + b2_ref[...], 0.0)
    # compact store: only the real a_dim lanes go back to HBM
    o_ref[...] = y[:, :a_dim].astype(o_ref.dtype)


def init_params(key, s_dim, a_dim, hidden=HIDDEN):
    # weights_init: Normal(0, 0.3) for Linear weights, bias = 0.1
    k1, k2 = jax.random.split(key)
    w1 = jax.random.normal(k1, (s_dim, hidden), dtype=jnp.float32) * 0.3
    b1 = jnp.full((hidden,), 0.1, dtype=jnp.float32)
    w2 = jax.random.normal(k2, (hidden, a_dim), dtype=jnp.float32) * 0.3
    b2 = jnp.full((a_dim,), 0.1, dtype=jnp.float32)
    return w1, b1, w2, b2


def pad_params(w1, b1, w2, b2):
    """Zero-pad hidden/a_dim to lane width (128) and cast weights to bf16.

    Padded bias entries are 0 (NOT 0.1) so ReLU'd padding stays exactly zero.
    Done once, outside the per-call path.  Only the MXU operands are padded;
    the kernel output is compact (B, a_dim).
    """
    s_dim, hidden = w1.shape
    a_dim = w2.shape[1]
    hp = _round_up(hidden, LANE)
    ap = _round_up(a_dim, LANE)
    w1p = jnp.zeros((s_dim, hp), jnp.bfloat16).at[:, :hidden].set(
        w1.astype(jnp.bfloat16))
    b1p = jnp.zeros((1, hp), jnp.float32).at[:, :hidden].set(b1[None, :])
    w2p = jnp.zeros((hp, ap), jnp.bfloat16).at[:hidden, :a_dim].set(
        w2.astype(jnp.bfloat16))
    b2p = jnp.zeros((1, ap), jnp.float32).at[:, :a_dim].set(b2[None, :])
    return w1p, b1p, w2p, b2p


def dqn_forward(x, w1p, b1p, w2p, b2p, a_dim):
    """x: (B, s_dim); padded params from pad_params. Returns (B, a_dim) f32."""
    B, s_dim = x.shape
    hp = w1p.shape[1]
    ap = w2p.shape[1]

    # Large batch tiles amortize the ~0.35us per-grid-step overhead; aim for
    # >=2 grid steps when B allows so both v7x TensorCores get work.
    TB = min(4096, _round_up(max(pl.cdiv(B, 2), 1), 8))
    grid = (pl.cdiv(B, TB),)   # ragged last tile handled by Pallas (rows indep.)

    out = pl.pallas_call(
        dqn_kernel,
        out_shape=jax.ShapeDtypeStruct((B, a_dim), jnp.float32),
        grid=grid,
        in_specs=[
            pl.BlockSpec((TB, s_dim), lambda i: (i, 0)),   # batch-tiled input
            pl.BlockSpec((s_dim, hp), lambda i: (0, 0)),   # weights resident
            pl.BlockSpec((1, hp), lambda i: (0, 0)),
            pl.BlockSpec((hp, ap), lambda i: (0, 0)),
            pl.BlockSpec((1, ap), lambda i: (0, 0)),
        ],
        out_specs=pl.BlockSpec((TB, a_dim), lambda i: (i, 0)),  # compact store
        compiler_params=pltpu.CompilerParams(
            dimension_semantics=("parallel",),      # 2 TCs on v7x; no-op on v5e/v6e
            vmem_limit_bytes=32 * 1024 * 1024,
        ),
    )(x, w1p, b1p, w2p, b2p)

    return out


if __name__ == "__main__":
    key = jax.random.PRNGKey(0)
    kx, kp = jax.random.split(key)

    B, s_dim, a_dim = 8, 8, 4  # small shapes consistent with DQN usage
    x = jax.random.normal(kx, (B, s_dim), dtype=jnp.float32)
    w1, b1, w2, b2 = init_params(kp, s_dim, a_dim)
    w1p, b1p, w2p, b2p = pad_params(w1, b1, w2, b2)

    out = dqn_forward(x, w1p, b1p, w2p, b2p, a_dim)
    jax.block_until_ready(out)

    # pure-JAX reference mirroring the kernel's bf16-operand / f32-accumulate path
    xf = x.astype(jnp.bfloat16).astype(jnp.float32)
    w1f = w1.astype(jnp.bfloat16).astype(jnp.float32)
    w2f = w2.astype(jnp.bfloat16).astype(jnp.float32)
    h_ref = jnp.maximum(
        jnp.dot(xf, w1f, precision=jax.lax.Precision.HIGHEST) + b1[None, :], 0.0)
    y_ref = jnp.maximum(
        jnp.dot(h_ref.astype(jnp.bfloat16).astype(jnp.float32), w2f,
                precision=jax.lax.Precision.HIGHEST) + b2[None, :], 0.0)

    assert out.shape == (B, a_dim)
    assert jnp.allclose(out, y_ref, atol=2e-3, rtol=2e-3)

    print("KERNEL_OK")
</pallas_src>

<mosaic_0001>
module attributes {stable_mosaic.version = 11 : i64} {
  func.func @dqn_kernel(%arg0: i32, %arg1: memref<8x8xf32, #tpu.memory_space<vmem>>, %arg2: memref<8x128xbf16, #tpu.memory_space<vmem>>, %arg3: memref<1x128xf32, #tpu.memory_space<vmem>>, %arg4: memref<128x128xbf16, #tpu.memory_space<vmem>>, %arg5: memref<1x128xf32, #tpu.memory_space<vmem>>, %arg6: memref<8x4xf32, #tpu.memory_space<vmem>>) attributes {dimension_semantics = [#tpu.dimension_semantics<parallel>], iteration_bounds = array<i64: 1>, scalar_prefetch = 0 : i64, scratch_operands = 0 : i64, tpu.core_type = #tpu.core_type<tc>, window_params = [{transform_indices = @transform_0, window_bounds = array<i64: 8, 8>}, {pipeline_mode = #tpu.pipeline_mode<synchronous>, transform_indices = @transform_1, window_bounds = array<i64: 8, 128>}, {pipeline_mode = #tpu.pipeline_mode<synchronous>, transform_indices = @transform_2, window_bounds = array<i64: 1, 128>}, {pipeline_mode = #tpu.pipeline_mode<synchronous>, transform_indices = @transform_3, window_bounds = array<i64: 128, 128>}, {pipeline_mode = #tpu.pipeline_mode<synchronous>, transform_indices = @transform_4, window_bounds = array<i64: 1, 128>}, {transform_indices = @transform_5, window_bounds = array<i64: 8, 4>}]} {
    %c0 = arith.constant 0 : index
    %c0_0 = arith.constant 0 : index
    %0 = vector.load %arg1[%c0, %c0_0] : memref<8x8xf32, #tpu.memory_space<vmem>>, vector<8x8xf32>
    %1 = arith.truncf %0 : vector<8x8xf32> to vector<8x8xbf16>
    %c0_1 = arith.constant 0 : index
    %c0_2 = arith.constant 0 : index
    %2 = vector.load %arg2[%c0_1, %c0_2] : memref<8x128xbf16, #tpu.memory_space<vmem>>, vector<8x128xbf16>
    %cst = arith.constant dense<0.000000e+00> : vector<8x128xf32>
    %3 = tpu.matmul %1, %2, %cst {dimension_numbers = #tpu.dot_dimension_numbers<[1], [0], [0], [1], [0, 0, 1, 1], [], []>} : vector<8x8xbf16>, vector<8x128xbf16>, vector<8x128xf32> -> vector<8x128xf32>
    %c0_3 = arith.constant 0 : index
    %c0_4 = arith.constant 0 : index
    %4 = vector.load %arg3[%c0_3, %c0_4] : memref<1x128xf32, #tpu.memory_space<vmem>>, vector<1x128xf32>
    %5 = vector.broadcast %4 : vector<1x128xf32> to vector<8x128xf32>
    %6 = arith.addf %3, %5 : vector<8x128xf32>
    %cst_5 = arith.constant 0.000000e+00 : f32
    %7 = vector.broadcast %cst_5 : f32 to vector<8x128xf32>
    %8 = arith.maximumf %6, %7 : vector<8x128xf32>
    %9 = arith.truncf %8 : vector<8x128xf32> to vector<8x128xbf16>
    %c0_6 = arith.constant 0 : index
    %c0_7 = arith.constant 0 : index
    %10 = vector.load %arg4[%c0_6, %c0_7] : memref<128x128xbf16, #tpu.memory_space<vmem>>, vector<128x128xbf16>
    %cst_8 = arith.constant dense<0.000000e+00> : vector<8x128xf32>
    %11 = tpu.matmul %9, %10, %cst_8 {dimension_numbers = #tpu.dot_dimension_numbers<[1], [0], [0], [1], [0, 0, 1, 1], [], []>} : vector<8x128xbf16>, vector<128x128xbf16>, vector<8x128xf32> -> vector<8x128xf32>
    %c0_9 = arith.constant 0 : index
    %c0_10 = arith.constant 0 : index
    %12 = vector.load %arg5[%c0_9, %c0_10] : memref<1x128xf32, #tpu.memory_space<vmem>>, vector<1x128xf32>
    %13 = vector.broadcast %12 : vector<1x128xf32> to vector<8x128xf32>
    %14 = arith.addf %11, %13 : vector<8x128xf32>
    %cst_11 = arith.constant 0.000000e+00 : f32
    %15 = vector.broadcast %cst_11 : f32 to vector<8x128xf32>
    %16 = arith.maximumf %14, %15 : vector<8x128xf32>
    %17 = vector.extract_strided_slice %16 {offsets = [0, 0], sizes = [8, 4], strides = [1, 1]} : vector<8x128xf32> to vector<8x4xf32>
    %c0_12 = arith.constant 0 : index
    %c0_13 = arith.constant 0 : index
    %18 = vector.load %arg6[%c0_12, %c0_13] : memref<8x4xf32, #tpu.memory_space<vmem>>, vector<8x4xf32>
    tpu.vector_store %arg6[%c0_12, %c0_13], %17 {strides = array<i32>} : memref<8x4xf32, #tpu.memory_space<vmem>>, vector<8x4xf32>,
    return
  }
  func.func @transform_0(%arg0: i32) -> (i32, i32) {
    %c0_i32 = arith.constant 0 : i32
    %c0_i32_0 = arith.constant 0 : i32
    return %arg0, %c0_i32 : i32, i32
  }
  func.func @transform_1(%arg0: i32) -> (i32, i32) {
    %c0_i32 = arith.constant 0 : i32
    %c0_i32_0 = arith.constant 0 : i32
    %c0_i32_1 = arith.constant 0 : i32
    return %c0_i32, %c0_i32_0 : i32, i32
  }
  func.func @transform_2(%arg0: i32) -> (i32, i32) {
    %c0_i32 = arith.constant 0 : i32
    %c0_i32_0 = arith.constant 0 : i32
    %c0_i32_1 = arith.constant 0 : i32
    return %c0_i32, %c0_i32_0 : i32, i32
  }
  func.func @transform_3(%arg0: i32) -> (i32, i32) {
    %c0_i32 = arith.constant 0 : i32
    %c0_i32_0 = arith.constant 0 : i32
    %c0_i32_1 = arith.constant 0 : i32
    return %c0_i32, %c0_i32_0 : i32, i32
  }
  func.func @transform_4(%arg0: i32) -> (i32, i32) {
    %c0_i32 = arith.constant 0 : i32
    %c0_i32_0 = arith.constant 0 : i32
    %c0_i32_1 = arith.constant 0 : i32
    return %c0_i32, %c0_i32_0 : i32, i32
  }
  func.func @transform_5(%arg0: i32) -> (i32, i32) {
    %c0_i32 = arith.constant 0 : i32
    %c0_i32_0 = arith.constant 0 : i32
    return %arg0, %c0_i32 : i32, i32
  }
}

</mosaic_0001>

<bundles_post_ra>
// kernel: tpu_custom_call.1
= control target key start
LH: loop header
LB: loop body
LE: loop exit
PB: predicated region body
PF: predicated region fallthrough
CT: control target
= control target key end

     0   :  { %10 = vsyncpa [#allocation3], 0  ;;  %s361_s0 = inlined_call_operand.hbm [shape: f32[8,8], index: 0, kind: input, shape index: {}]   ;;  %s362_s1 = inlined_call_operand.hbm [shape: bf16[8,128], index: 1, kind: input, shape index: {}]   ;;  %s363_s2 = inlined_call_operand.vmem [shape: f32[1,128], index: 2, kind: input, shape index: {}]   ;;  %s364_s3 = inlined_call_operand.hbm [shape: bf16[128,128], index: 3, kind: input, shape index: {}]   ;;  %s365_s4 = inlined_call_operand.vmem [shape: f32[1,128], index: 4, kind: input, shape index: {}]   ;;  %s366_s5 = inlined_call_operand.vmem [shape: f32[8,4], index: 5, kind: output, shape index: {}]  }
   0x1   :  { %11 = vsyncpa [#allocation5], 0  ;;  %s28_s20 = sshll.u32 %s362_s1, 4  ;;  %s308_s21 = smov [#allocation4]   ;;  %s29_s20 = int_to_ptr.hbm [resolvable:$true] %s28_s20 }
   0x2   :  { %s30_s22 = sshll.u32 %s308_s21, 4  ;;  %s17_s25 = sshll.u32 %s361_s0, 4  ;;  %s31_s22 = int_to_ptr.vmem [resolvable:$true] %s30_s22  ;;  %s18_s25 = int_to_ptr.hbm [resolvable:$true] %s17_s25 }
   0x3   :  { %33 = dma.hbm_to_vmem [thread:$0]  %s29_s20, 64, %s31_s22, [#allocation5]  }
   0x4   :  { %s309_s26 = smov [#allocation2]   ;;  %s40_s30 = sshll.u32 %s364_s3, 4  ;;  %s41_s30 = int_to_ptr.hbm [resolvable:$true] %s40_s30 }
   0x5   :  { %s19_s27 = sshll.u32 %s309_s26, 4  ;;  %s310_s1 = smov [#allocation6]   ;;  %s20_s27 = int_to_ptr.vmem [resolvable:$true] %s19_s27 }
   0x6   :  { %22 = dma.hbm_to_vmem [thread:$0]  %s18_s25, 128, %s20_s27, [#allocation3]  }
   0x7   :  { %s42_s6 = sshll.u32 %s310_s1, 4  ;;  %s311_s7 = smov 64   ;;  %s43_s6 = int_to_ptr.vmem [resolvable:$true] %s42_s6 }
   0x8   :  { %s312_s8 = smov 4  }
   0x9   :  { %48 = dma.hbm_to_vmem [thread:$0]  %s41_s30, 1024, %s43_s6, [#allocation5], %s311_s7, %s311_s7, %s312_s8  }
   0xa   :  { %304 = dma.done.wait [#allocation3], 128  }
   0xb   :  { %305 = vsyncadd [#allocation3], 4294967168 }
   0xc   :  { %306 = dma.done.wait [#allocation5], 1088  }
   0xd   :  { %307 = vsyncadd [#allocation5], 4294966208  ;;  %vm75_vm0 = vcmask 1043456   ;;  %v66_v0 = vld [vmem:[#allocation4] sm:$0xf]  ;;  %v64_v1 = vld [vmem:[#allocation2] sm:$0xff] }
   0xe   :  { %v224_v2 = vld [vmem:[#allocation6 + $0x38] sm:$0xff]  ;;  %v77_v3 = vsel %vm75_vm0, %v66_v0, 0  ;;  %v65_v4 = vpack.c.bf16 %v64_v1, %v64_v1  ;;  %vm71_vm1 = vcmask 64512   ;;  %v223_v5 = vld [vmem:[#allocation6 + $0x30] sm:$0xff]  ;;  %v222_v6 = vld [vmem:[#allocation6 + $0x28] sm:$0xff]  ;;  %vm176_vm2 = vcmask 31744  }
   0xf   :  { %86 = vmatpush.bf16.msra.mxu0 %v77_v3  ;;  %162 = vmatpush.bf16.msra.mxu1 %v224_v2  ;;  %v221_v7 = vld [vmem:[#allocation6 + $0x20] sm:$0xff]  ;;  %v220_v8 = vld [vmem:[#allocation6 + $0x18] sm:$0xff]  ;;  %v219_v9 = vld [vmem:[#allocation6 + $0x10] sm:$0xff] }
  0x10   :  { %v218_v10 = vld [vmem:[#allocation6 + $0x8] sm:$0xff]  ;;  %v217_v11 = vld [vmem:[#allocation6] sm:$0xff]  ;;  %v230_v12 = vld [vmem:[%s363_s2] ss:$0 sm:$0xff] }
  0x11   :  { %v231_v18 = vld [vmem:[%s365_s4] ss:$0 sm:$0xff] }
  0x12   :  { %184 = vmatmul.msk.bf16.vlgmr.msra.gmra.mxu0 %vm71_vm1, %v65_v4 }
  0x13   :  { %163 = vmatpush.bf16.msra.mxu1 %v223_v5 }
  0x17   :  { %164 = vmatpush.bf16.msra.mxu1 %v222_v6 }
  0x1b   :  { %165 = vmatpush.bf16.msra.mxu1 %v221_v7 }
  0x1f   :  { %166 = vmatpush.bf16.msra.mxu1 %v220_v8 }
  0x23   :  { %167 = vmatpush.bf16.msra.mxu1 %v219_v9 }
  0x27   :  { %168 = vmatpush.bf16.msra.mxu1 %v218_v10 }
  0x2b   :  { %169 = vmatpush.bf16.msra.mxu1 %v217_v11 }
  0x8f   :  { %v88_v13 = vpop.f32.mrf.mxu0 }
  0x90   :  { %v89_v14 = vadd.f32 %v230_v12, %v88_v13 }
  0x92   :  { %v92_v15 = vmax.f32 %v89_v14, 0.0 }
  0x94   :  { %v93_v16 = vpack.c.bf16 %v92_v15, %v92_v15 }
  0x96   :  { %170 = vmatmul.bf16.vlgmr.msra.gmra.mxu1 %v93_v16 }
  0x97   :  { %v90_v17 = vpop.f32.mrf.mxu0 }
 0x113   :  { %v171_v19 = vpop.f32.mrf.mxu1 }
 0x114   :  { %v172_v20 = vadd.f32 %v231_v18, %v171_v19 }
 0x116   :  { %v175_v21 = vmax.f32 %v172_v20, 0.0 }
 0x118   :  { %177 = vst.msk [vmem:[%s366_s5] sm:$0xff] %vm176_vm2, %v175_v21 }
 0x11b   :  { %v173_v22 = vpop.f32.mrf.mxu1 }
 0x11c   :  { %182 = vsyncpa [#allocation3], 1 }
 0x11d   :  { %183 = vsyncpa [#allocation5], 1 }

</bundles_post_ra>
